<compile_context>
chip_gen: v7x
topology: tpu7x:2x2x1
jax: 0.10.0
libtpu: 0.0.40
codegen_flags: <defaults>
</compile_context>

<pallas_src>
import jax
import jax.numpy as jnp
from jax.experimental import pallas as pl
from jax.experimental.pallas import tpu as pltpu

_INV_SQRT2 = 0.7071067811865476  # 1/sqrt(2), hoisted constant


def _feedforward_kernel(x_ref, w1_ref, b1_ref, w2_ref, b2_ref, o_ref):
    x = x_ref[...]      # (TM, E)  current M tile (pipelined)
    w1 = w1_ref[...]    # (E, E)   resident across grid steps
    b1 = b1_ref[...]    # (1, E)
    w2 = w2_ref[...]    # (E, E)
    b2 = b2_ref[...]    # (1, E)

    # layer1: x @ W1 + b1
    h = jnp.dot(x, w1, preferred_element_type=jnp.float32) + b1
    # exact erf-based GELU (matches torch.nn.functional.gelu default)
    h = h * 0.5 * (1.0 + jax.lax.erf(h * _INV_SQRT2))
    # layer2: h @ W2 + b2
    out = jnp.dot(h, w2, preferred_element_type=jnp.float32) + b2
    o_ref[...] = out.astype(o_ref.dtype)


def _round_up(n, m):
    return ((n + m - 1) // m) * m


def feedforward(x, w1, b1, w2, b2, *, tm_max=512):
    """x: (batch, seq, embed) float32.  w1, w2: (E_in, E_out).  Returns (batch, seq, embed)."""
    batch, seq, embed = x.shape
    m = batch * seq

    # Lane-pad E to a multiple of 128; sublane/tile-pad M to a multiple of TM.
    e_pad = _round_up(embed, 128)
    tm = max(8, min(tm_max, _round_up(m, 8)))   # multiple of 8, capped at tm_max
    m_pad = _round_up(m, tm)
    grid_m = m_pad // tm

    x2d = jnp.pad(x.reshape(m, embed), ((0, m_pad - m), (0, e_pad - embed)))
    w1p = jnp.pad(w1, ((0, e_pad - embed), (0, e_pad - embed)))
    w2p = jnp.pad(w2, ((0, e_pad - embed), (0, e_pad - embed)))
    b1p = jnp.pad(b1.reshape(1, embed), ((0, 0), (0, e_pad - embed)))
    b2p = jnp.pad(b2.reshape(1, embed), ((0, 0), (0, e_pad - embed)))

    itemsize = jnp.dtype(x.dtype).itemsize
    # double-buffered x & out tiles + two resident weights + two biases (+ headroom)
    vmem_bytes = (2 * 2 * tm * e_pad + 2 * e_pad * e_pad + 2 * 2 * e_pad) * itemsize
    vmem_limit = int(min(100 * (1 << 20), max(2 * vmem_bytes, 32 * (1 << 20))))

    cost = pl.CostEstimate(
        flops=2 * 2 * m_pad * e_pad * e_pad,                 # two E x E matmuls
        transcendentals=m_pad * e_pad,                       # erf per element
        bytes_accessed=(2 * m_pad * e_pad + 2 * e_pad * e_pad + 2 * e_pad) * itemsize,
    )

    out2d = pl.pallas_call(
        _feedforward_kernel,
        out_shape=jax.ShapeDtypeStruct((m_pad, e_pad), x.dtype),
        grid_spec=pltpu.PrefetchScalarGridSpec(
            num_scalar_prefetch=0,
            grid=(grid_m,),
            in_specs=[
                pl.BlockSpec((tm, e_pad), lambda i: (i, 0)),      # x tile (pipelined)
                pl.BlockSpec((e_pad, e_pad), lambda i: (0, 0)),   # W1 resident
                pl.BlockSpec((1, e_pad), lambda i: (0, 0)),       # b1 resident
                pl.BlockSpec((e_pad, e_pad), lambda i: (0, 0)),   # W2 resident
                pl.BlockSpec((1, e_pad), lambda i: (0, 0)),       # b2 resident
            ],
            out_specs=pl.BlockSpec((tm, e_pad), lambda i: (i, 0)),
        ),
        compiler_params=pltpu.CompilerParams(
            dimension_semantics=("parallel",),
            vmem_limit_bytes=vmem_limit,
        ),
        cost_estimate=cost,
    )(x2d, w1p, b1p, w2p, b2p)

    return out2d[:m, :embed].reshape(batch, seq, embed)


if __name__ == "__main__":
    # Small shapes consistent with the module: (batch, seq, embed)
    batch, seq, embed = 2, 8, 32

    key = jax.random.PRNGKey(0)
    kx, kw1, kb1, kw2, kb2 = jax.random.split(key, 5)

    x = jax.random.normal(kx, (batch, seq, embed), dtype=jnp.float32)

    # Deterministic init mimicking nn.Linear's uniform(-1/sqrt(fan_in), 1/sqrt(fan_in)).
    bound = 1.0 / jnp.sqrt(jnp.float32(embed))
    w1 = jax.random.uniform(kw1, (embed, embed), jnp.float32, -bound, bound)  # (E_in, E_out)
    b1 = jax.random.uniform(kb1, (embed,), jnp.float32, -bound, bound)
    w2 = jax.random.uniform(kw2, (embed, embed), jnp.float32, -bound, bound)
    b2 = jax.random.uniform(kb2, (embed,), jnp.float32, -bound, bound)

    out = feedforward(x, w1, b1, w2, b2)
    jax.block_until_ready(out)

    # Reference check in plain JAX (same math as the PyTorch module: Linear -> GELU -> Linear).
    ref = jax.nn.gelu(x @ w1 + b1, approximate=False) @ w2 + b2
    assert out.shape == (batch, seq, embed)
    assert jnp.allclose(out, ref, atol=1e-5, rtol=1e-5), "mismatch vs reference"

    print("KERNEL_OK")
</pallas_src>

<mosaic_0001>
module attributes {stable_mosaic.version = 11 : i64} {
  func.func @_feedforward_kernel(%arg0: i32, %arg1: memref<16x128xf32, #tpu.memory_space<vmem>>, %arg2: memref<128x128xf32, #tpu.memory_space<vmem>>, %arg3: memref<1x128xf32, #tpu.memory_space<vmem>>, %arg4: memref<128x128xf32, #tpu.memory_space<vmem>>, %arg5: memref<1x128xf32, #tpu.memory_space<vmem>>, %arg6: memref<16x128xf32, #tpu.memory_space<vmem>>) attributes {dimension_semantics = [#tpu.dimension_semantics<parallel>], iteration_bounds = array<i64: 1>, scalar_prefetch = 0 : i64, scratch_operands = 0 : i64, tpu.core_type = #tpu.core_type<tc>, window_params = [{transform_indices = @transform_0, window_bounds = array<i64: 16, 128>}, {pipeline_mode = #tpu.pipeline_mode<synchronous>, transform_indices = @transform_1, window_bounds = array<i64: 128, 128>}, {pipeline_mode = #tpu.pipeline_mode<synchronous>, transform_indices = @transform_2, window_bounds = array<i64: 1, 128>}, {pipeline_mode = #tpu.pipeline_mode<synchronous>, transform_indices = @transform_3, window_bounds = array<i64: 128, 128>}, {pipeline_mode = #tpu.pipeline_mode<synchronous>, transform_indices = @transform_4, window_bounds = array<i64: 1, 128>}, {transform_indices = @transform_5, window_bounds = array<i64: 16, 128>}]} {
    %c0 = arith.constant 0 : index
    %c0_0 = arith.constant 0 : index
    %0 = vector.load %arg1[%c0, %c0_0] : memref<16x128xf32, #tpu.memory_space<vmem>>, vector<16x128xf32>
    %c0_1 = arith.constant 0 : index
    %c0_2 = arith.constant 0 : index
    %1 = vector.load %arg2[%c0_1, %c0_2] : memref<128x128xf32, #tpu.memory_space<vmem>>, vector<128x128xf32>
    %c0_3 = arith.constant 0 : index
    %c0_4 = arith.constant 0 : index
    %2 = vector.load %arg3[%c0_3, %c0_4] : memref<1x128xf32, #tpu.memory_space<vmem>>, vector<1x128xf32>
    %c0_5 = arith.constant 0 : index
    %c0_6 = arith.constant 0 : index
    %3 = vector.load %arg4[%c0_5, %c0_6] : memref<128x128xf32, #tpu.memory_space<vmem>>, vector<128x128xf32>
    %c0_7 = arith.constant 0 : index
    %c0_8 = arith.constant 0 : index
    %4 = vector.load %arg5[%c0_7, %c0_8] : memref<1x128xf32, #tpu.memory_space<vmem>>, vector<1x128xf32>
    %cst = arith.constant dense<0.000000e+00> : vector<16x128xf32>
    %5 = tpu.matmul %0, %1, %cst {dimension_numbers = #tpu.dot_dimension_numbers<[1], [0], [0], [1], [0, 0, 1, 1], [], []>} : vector<16x128xf32>, vector<128x128xf32>, vector<16x128xf32> -> vector<16x128xf32>
    %6 = vector.broadcast %2 : vector<1x128xf32> to vector<16x128xf32>
    %7 = arith.addf %5, %6 : vector<16x128xf32>
    %cst_9 = arith.constant 5.000000e-01 : f32
    %8 = vector.broadcast %cst_9 : f32 to vector<16x128xf32>
    %9 = arith.mulf %7, %8 : vector<16x128xf32>
    %cst_10 = arith.constant 0.707106769 : f32
    %10 = vector.broadcast %cst_10 : f32 to vector<16x128xf32>
    %11 = arith.mulf %7, %10 : vector<16x128xf32>
    %12 = math.erf %11 : vector<16x128xf32>
    %cst_11 = arith.constant 1.000000e+00 : f32
    %13 = vector.broadcast %cst_11 : f32 to vector<16x128xf32>
    %14 = arith.addf %13, %12 : vector<16x128xf32>
    %15 = arith.mulf %9, %14 : vector<16x128xf32>
    %cst_12 = arith.constant dense<0.000000e+00> : vector<16x128xf32>
    %16 = tpu.matmul %15, %3, %cst_12 {dimension_numbers = #tpu.dot_dimension_numbers<[1], [0], [0], [1], [0, 0, 1, 1], [], []>} : vector<16x128xf32>, vector<128x128xf32>, vector<16x128xf32> -> vector<16x128xf32>
    %17 = vector.broadcast %4 : vector<1x128xf32> to vector<16x128xf32>
    %18 = arith.addf %16, %17 : vector<16x128xf32>
    %c0_13 = arith.constant 0 : index
    %c0_14 = arith.constant 0 : index
    %19 = vector.load %arg6[%c0_13, %c0_14] : memref<16x128xf32, #tpu.memory_space<vmem>>, vector<16x128xf32>
    tpu.vector_store %arg6[%c0_13, %c0_14], %18 {strides = array<i32>} : memref<16x128xf32, #tpu.memory_space<vmem>>, vector<16x128xf32>,
    return
  }
  func.func @transform_0(%arg0: i32) -> (i32, i32) {
    %c0_i32 = arith.constant 0 : i32
    %c0_i32_0 = arith.constant 0 : i32
    return %arg0, %c0_i32 : i32, i32
  }
  func.func @transform_1(%arg0: i32) -> (i32, i32) {
    %c0_i32 = arith.constant 0 : i32
    %c0_i32_0 = arith.constant 0 : i32
    %c0_i32_1 = arith.constant 0 : i32
    return %c0_i32, %c0_i32_0 : i32, i32
  }
  func.func @transform_2(%arg0: i32) -> (i32, i32) {
    %c0_i32 = arith.constant 0 : i32
    %c0_i32_0 = arith.constant 0 : i32
    %c0_i32_1 = arith.constant 0 : i32
    return %c0_i32, %c0_i32_0 : i32, i32
  }
  func.func @transform_3(%arg0: i32) -> (i32, i32) {
    %c0_i32 = arith.constant 0 : i32
    %c0_i32_0 = arith.constant 0 : i32
    %c0_i32_1 = arith.constant 0 : i32
    return %c0_i32, %c0_i32_0 : i32, i32
  }
  func.func @transform_4(%arg0: i32) -> (i32, i32) {
    %c0_i32 = arith.constant 0 : i32
    %c0_i32_0 = arith.constant 0 : i32
    %c0_i32_1 = arith.constant 0 : i32
    return %c0_i32, %c0_i32_0 : i32, i32
  }
  func.func @transform_5(%arg0: i32) -> (i32, i32) {
    %c0_i32 = arith.constant 0 : i32
    %c0_i32_0 = arith.constant 0 : i32
    return %arg0, %c0_i32 : i32, i32
  }
}

</mosaic_0001>

<bundles_post_ra>
// kernel: tpu_custom_call.1
= control target key start
LH: loop header
LB: loop body
LE: loop exit
PB: predicated region body
PF: predicated region fallthrough
CT: control target
= control target key end

     0   :  { %10 = vsyncpa [#allocation3], 0  ;;  %s675_s0 = inlined_call_operand.hbm [shape: f32[16,128], index: 0, kind: input, shape index: {}]   ;;  %s676_s1 = inlined_call_operand.hbm [shape: f32[128,128], index: 1, kind: input, shape index: {}]   ;;  %s677_s2 = inlined_call_operand.vmem [shape: f32[1,128], index: 2, kind: input, shape index: {}]   ;;  %s678_s3 = inlined_call_operand.hbm [shape: f32[128,128], index: 3, kind: input, shape index: {}]   ;;  %s679_s4 = inlined_call_operand.vmem [shape: f32[1,128], index: 4, kind: input, shape index: {}]   ;;  %s680_s5 = inlined_call_operand.hbm [shape: f32[16,128], index: 5, kind: output, shape index: {}]  }
   0x1   :  { %11 = vsyncpa [#allocation6], 0 }
   0x2   :  { %12 = vsyncpa [#allocation4], 0  ;;  %s566_s18 = smov [#allocation5]   ;;  %s567_s20 = smov [#allocation2]  }
   0x3   :  { %s30_s19 = sshll.u32 %s566_s18, 4  ;;  %s18_s21 = sshll.u32 %s567_s20, 4  ;;  %s31_s19 = int_to_ptr.vmem [resolvable:$true] %s30_s19  ;;  %s602_s21 = int_to_ptr.vmem [resolvable:$true] %s18_s21 }
   0x4   :  { %s472_s24 = scalar_lea.hbm %s676_s1, 2048 }
   0x5   :  { %p473_p0 = scmp.ne.s32.totalorder %s676_s1, %s472_s24  ;;  %p476_p1 = scmp.lt.u32.totalorder %s472_s24, %s676_s1 }
   0x7   :  { %p478_p2 = pnand %p476_p1, %p473_p0 }
   0x9   :  { %481 = shalt.err (!%p478_p2)
}
   0xa   :  { %s482_s29 = scalar_lea.vmem %s31_s19, 2048  ;;  %p487_p4 = scmp.lt.s32.totalorder %s31_s19, %s31_s19 }
   0xb   :  { %p483_p3 = scmp.ne.s32.totalorder %s31_s19, %s482_s29  ;;  %p488_p5 = scmp.lt.s32.totalorder %s482_s29, %s482_s29 }
   0xd   :  { %p489_p6 = por %p488_p5, %p487_p4 }
   0xf   :  { %p490_p7 = pnand %p489_p6, %p483_p3 }
  0x11   :  { %493 = shalt.err (!%p490_p7)
}
  0x12   :  { %s568_s30 = smov 128   ;;  %s569_s6 = smov 8  }
  0x13   :  { %36 = dma.hbm_to_vmem [thread:$0]  %s676_s1, 2048, %s31_s19, [#allocation6], %s568_s30, %s568_s30, %s569_s6  }
  0x14   :  { %s494_s11 = scalar_lea.hbm %s675_s0, 256 }
  0x15   :  { %p495_p8 = scmp.ne.s32.totalorder %s675_s0, %s494_s11  ;;  %p498_p9 = scmp.lt.u32.totalorder %s494_s11, %s675_s0 }
  0x17   :  { %p500_p10 = pnand %p498_p9, %p495_p8 }
  0x19   :  { %503 = shalt.err (!%p500_p10)
}
  0x1a   :  { %s504_s16 = scalar_lea.vmem %s602_s21, 256  ;;  %p509_p12 = scmp.lt.s32.totalorder %s602_s21, %s602_s21 }
  0x1b   :  { %p505_p11 = scmp.ne.s32.totalorder %s602_s21, %s504_s16  ;;  %p510_p13 = scmp.lt.s32.totalorder %s504_s16, %s504_s16 }
  0x1d   :  { %p511_p0 = por %p510_p13, %p509_p12 }
  0x1f   :  { %p512_p1 = pnand %p511_p0, %p505_p11 }
  0x21   :  { %515 = shalt.err (!%p512_p1)
}
  0x22   :  { %24 = dma.hbm_to_vmem [thread:$0]  %s675_s0, 256, %s602_s21, [#allocation3], %s568_s30, %s568_s30, %s569_s6  }
  0x23   :  { %s570_s18 = smov [#allocation7]   ;;  %s516_s23 = scalar_lea.hbm %s678_s3, 2048 }
  0x24   :  { %s44_s19 = sshll.u32 %s570_s18, 4  ;;  %p517_p2 = scmp.ne.s32.totalorder %s678_s3, %s516_s23  ;;  %s45_s19 = int_to_ptr.vmem [resolvable:$true] %s44_s19 }
  0x25   :  { %p520_p3 = scmp.lt.u32.totalorder %s516_s23, %s678_s3 }
  0x27   :  { %p522_p4 = pnand %p520_p3, %p517_p2 }
  0x29   :  { %525 = shalt.err (!%p522_p4)
}
  0x2a   :  { %s526_s28 = scalar_lea.vmem %s45_s19, 2048  ;;  %p531_p6 = scmp.lt.s32.totalorder %s45_s19, %s45_s19 }
  0x2b   :  { %p527_p5 = scmp.ne.s32.totalorder %s45_s19, %s526_s28  ;;  %p532_p7 = scmp.lt.s32.totalorder %s526_s28, %s526_s28 }
  0x2d   :  { %p533_p8 = por %p532_p7, %p531_p6 }
  0x2f   :  { %p534_p9 = pnand %p533_p8, %p527_p5 }
  0x31   :  { %537 = shalt.err (!%p534_p9)
}
  0x32   :  { %50 = dma.hbm_to_vmem [thread:$0]  %s678_s3, 2048, %s45_s19, [#allocation6], %s568_s30, %s568_s30, %s569_s6  }
  0x33   :  { %560 = dma.done.wait [#allocation3], 256  }
  0x34   :  { %561 = vsyncadd [#allocation3], 4294967040 }
  0x35   :  { %562 = dma.done.wait [#allocation6], 4096  }
  0x36   :  { %563 = vsyncadd [#allocation6], 4294963200  ;;  %v64_v0 = vld [vmem:[#allocation5] sm:$0xff]  ;;  %v65_v1 = vld [vmem:[#allocation5 + $0x8] sm:$0xff]  ;;  %s571_s8 = smov [#allocation8]  }
  0x37   :  { %v66_v2 = vld [vmem:[#allocation5 + $0x10] sm:$0xff]  ;;  %v398_v3 = vpack.c.bf16 %v65_v1, %v64_v0  ;;  %v67_v4 = vld [vmem:[#allocation5 + $0x18] sm:$0xff]  ;;  %v68_v6 = vld [vmem:[#allocation5 + $0x20] sm:$0xff]  ;;  %s277_s9 = sshll.u32 %s571_s8, 4  ;;  %s278_s9 = int_to_ptr.vmem [resolvable:$true] %s277_s9 }
  0x38   :  { %v402_v5 = vpack.c.bf16 %v67_v4, %v66_v2  ;;  %v69_v7 = vld [vmem:[#allocation5 + $0x28] sm:$0xff]  ;;  %v70_v9 = vld [vmem:[#allocation5 + $0x30] sm:$0xff]  ;;  %v71_v10 = vld [vmem:[#allocation5 + $0x38] sm:$0xff]  ;;  %s538_s10 = scalar_lea.vmem %s278_s9, 256  ;;  %p543_p11 = scmp.lt.s32.totalorder %s278_s9, %s278_s9 }
  0x39   :  { %399 = vmatprep.subr.bf16.mxu0 %v398_v3  ;;  %v406_v8 = vpack.c.bf16 %v69_v7, %v68_v6  ;;  %v62_v11 = vld [vmem:[#allocation2] sm:$0xff]  ;;  %v81_v12 = vld [vmem:[#allocation7] sm:$0xff]  ;;  %v82_v13 = vld [vmem:[#allocation7 + $0x8] sm:$0xff]  ;;  %v410_v20 = vpack.c.bf16 %v71_v10, %v70_v9  ;;  %p539_p10 = scmp.ne.s32.totalorder %s278_s9, %s538_s10  ;;  %p544_p12 = scmp.lt.s32.totalorder %s538_s10, %s538_s10 }
  0x3a   :  { %401 = vmatpush3.bf16.msra.mxu0 %v398_v3  ;;  %360 = vmatprep.mubr.f32.mxu0 %v62_v11  ;;  %v83_v14 = vld [vmem:[#allocation7 + $0x10] sm:$0xff]  ;;  %v430_v15 = vpack.c.bf16 %v82_v13, %v81_v12  ;;  %v84_v16 = vld [vmem:[#allocation7 + $0x18] sm:$0xff]  ;;  %v85_v18 = vld [vmem:[#allocation7 + $0x20] sm:$0xff] }
  0x3b   :  { %403 = vmatprep.subr.bf16.mxu0 %v402_v5  ;;  %v434_v17 = vpack.c.bf16 %v84_v16, %v83_v14  ;;  %v86_v19 = vld [vmem:[#allocation7 + $0x28] sm:$0xff]  ;;  %v72_v21 = vld [vmem:[#allocation5 + $0x40] sm:$0xff]  ;;  %v74_v25 = vld [vmem:[#allocation5 + $0x50] sm:$0xff]  ;;  %p545_p13 = por %p544_p12, %p543_p11 }
  0x3c   :  { %431 = vmatprep.subr.bf16.mxu1 %v430_v15  ;;  %v73_v22 = vld [vmem:[#allocation5 + $0x48] sm:$0xff]  ;;  %v438_v23 = vpack.c.bf16 %v86_v19, %v85_v18  ;;  %v75_v26 = vld [vmem:[#allocation5 + $0x58] sm:$0xff]  ;;  %v76_v28 = vld [vmem:[#allocation5 + $0x60] sm:$0xff] }
  0x3d   :  { %433 = vmatpush3.bf16.msra.mxu1 %v430_v15  ;;  %v414_v24 = vpack.c.bf16 %v73_v22, %v72_v21  ;;  %v418_v27 = vpack.c.bf16 %v75_v26, %v74_v25  ;;  %v77_v29 = vld [vmem:[#allocation5 + $0x68] sm:$0xff]  ;;  %v78_v31 = vld [vmem:[#allocation5 + $0x70] sm:$0xff]  ;;  %v79_v32 = vld [vmem:[#allocation5 + $0x78] sm:$0xff]  ;;  %p546_p0 = pnand %p545_p13, %p539_p10 }
  0x3e   :  { %405 = vmatpush3.bf16.msra.mxu0 %v402_v5  ;;  %435 = vmatprep.subr.bf16.mxu1 %v434_v17  ;;  %v422_v30 = vpack.c.bf16 %v77_v29, %v76_v28  ;;  %v426_v33 = vpack.c.bf16 %v79_v32, %v78_v31  ;;  %v63_v34 = vld [vmem:[#allocation2 + $0x8] sm:$0xff]  ;;  %v87_v35 = vld [vmem:[#allocation7 + $0x30] sm:$0xff]  ;;  %v89_v38 = vld [vmem:[#allocation7 + $0x40] sm:$0xff] }
  0x3f   :  { %407 = vmatprep.subr.bf16.mxu0 %v406_v8  ;;  %v88_v36 = vld [vmem:[#allocation7 + $0x38] sm:$0xff]  ;;  %v90_v39 = vld [vmem:[#allocation7 + $0x48] sm:$0xff]  ;;  %v91_v41 = vld [vmem:[#allocation7 + $0x50] sm:$0xff] }
  0x40   :  { %v442_v37 = vpack.c.bf16 %v88_v36, %v87_v35  ;;  %v446_v40 = vpack.c.bf16 %v90_v39, %v89_v38  ;;  %v92_v42 = vld [vmem:[#allocation7 + $0x58] sm:$0xff]  ;;  %v93_v44 = vld [vmem:[#allocation7 + $0x60] sm:$0xff]  ;;  %v94_v45 = vld [vmem:[#allocation7 + $0x68] sm:$0xff] }
  0x41   :  { %437 = vmatpush3.bf16.msra.mxu1 %v434_v17  ;;  %v450_v43 = vpack.c.bf16 %v92_v42, %v91_v41  ;;  %v454_v46 = vpack.c.bf16 %v94_v45, %v93_v44  ;;  %v95_v47 = vld [vmem:[#allocation7 + $0x70] sm:$0xff]  ;;  %v96_v48 = vld [vmem:[#allocation7 + $0x78] sm:$0xff] }
  0x42   :  { %409 = vmatpush3.bf16.msra.mxu0 %v406_v8  ;;  %439 = vmatprep.subr.bf16.mxu1 %v438_v23  ;;  %v458_v49 = vpack.c.bf16 %v96_v48, %v95_v47  ;;  %v290_v50 = vld [vmem:[%s677_s2] ss:$0 sm:$0xff] }
  0x43   :  { %411 = vmatprep.subr.bf16.mxu0 %v410_v20  ;;  %v291_v1 = vld [vmem:[%s679_s4] ss:$0 sm:$0xff] }
  0x45   :  { %441 = vmatpush3.bf16.msra.mxu1 %v438_v23 }
  0x46   :  { %413 = vmatpush3.bf16.msra.mxu0 %v410_v20  ;;  %443 = vmatprep.subr.bf16.mxu1 %v442_v37 }
  0x47   :  { %415 = vmatprep.subr.bf16.mxu0 %v414_v24 }
  0x49   :  { %445 = vmatpush3.bf16.msra.mxu1 %v442_v37 }
  0x4a   :  { %417 = vmatpush3.bf16.msra.mxu0 %v414_v24  ;;  %447 = vmatprep.subr.bf16.mxu1 %v446_v40 }
  0x4b   :  { %419 = vmatprep.subr.bf16.mxu0 %v418_v27 }
  0x4d   :  { %449 = vmatpush3.bf16.msra.mxu1 %v446_v40 }
  0x4e   :  { %421 = vmatpush3.bf16.msra.mxu0 %v418_v27  ;;  %451 = vmatprep.subr.bf16.mxu1 %v450_v43 }
  0x4f   :  { %423 = vmatprep.subr.bf16.mxu0 %v422_v30 }
  0x51   :  { %453 = vmatpush3.bf16.msra.mxu1 %v450_v43 }
  0x52   :  { %425 = vmatpush3.bf16.msra.mxu0 %v422_v30  ;;  %455 = vmatprep.subr.bf16.mxu1 %v454_v46 }
  0x53   :  { %427 = vmatprep.subr.bf16.mxu0 %v426_v33 }
  0x55   :  { %457 = vmatpush3.bf16.msra.mxu1 %v454_v46 }
  0x56   :  { %429 = vmatpush3.bf16.msra.mxu0 %v426_v33  ;;  %459 = vmatprep.subr.bf16.mxu1 %v458_v49 }
  0x59   :  { %361 = vmatmul.mubr.f32.vlgmr.msra.gmra.mrb[0].mxu0 %v63_v34  ;;  %461 = vmatpush3.bf16.msra.mxu1 %v458_v49 }
 0x12c   :  { %v362_v51 = vpop.f32.mrb[0].mxu0 }
 0x12d   :  { %v176_v52 = vadd.f32 %v362_v51, %v290_v50  ;;  %v170_v53 = vpop.f32.mrb[1].mxu0 }
 0x12e   :  { %v171_v54 = vadd.f32 %v290_v50, %v170_v53 }
 0x12f   :  { %v182_v55 = vmul.f32 0.70710677, %v176_v52  ;;  %v180_v62 = vmul.f32 0.5, %v176_v52 }
 0x130   :  { %v181_v56 = vmul.f32 0.70710677, %v171_v54  ;;  %v179_v60 = vmul.f32 0.5, %v171_v54 }
 0x131   :  { %468 = verf.f32 %v182_v55 }
 0x132   :  { %470 = verf.f32 %v181_v56 }
 0x13b   :  { %v469_v57 = vpop.eup %468 }
 0x13c   :  { %v471_v58 = vpop.eup %470  ;;  %v186_v59 = vadd.f32 1.0, %v469_v57 }
 0x13d   :  { %v185_v61 = vadd.f32 1.0, %v471_v58 }
 0x13e   :  { %v188_v0 = vmul.f32 %v186_v59, %v180_v62 }
 0x13f   :  { %v187_v63 = vmul.f32 %v185_v61, %v179_v60 }
 0x141   :  { %395 = vmatprep.mubr.f32.mxu1 %v187_v63 }
 0x142   :  { %396 = vmatmul.mubr.f32.vlgmr.msra.gmra.mrb[0].mxu1 %v188_v0 }
 0x215   :  { %v397_v2 = vpop.f32.mrb[0].mxu1 }
 0x216   :  { %v267_v3 = vadd.f32 %v397_v2, %v291_v1  ;;  %v261_v4 = vpop.f32.mrb[1].mxu1 }
 0x217   :  { %v262_v5 = vadd.f32 %v291_v1, %v261_v4 }
 0x218   :  { %271 = vst [vmem:[#allocation8 + $0x8] sm:$0xff] %v267_v3 }
 0x219   :  { %270 = vst [vmem:[#allocation8] sm:$0xff] %v262_v5 }
 0x21a   :  { %549 = shalt.err (!%p546_p0)
}
 0x21b   :  { %s550_s4 = scalar_lea.hbm %s680_s5, 256 }
 0x21c   :  { %p551_p1 = scmp.ne.s32.totalorder %s680_s5, %s550_s4  ;;  %p554_p2 = scmp.lt.u32.totalorder %s550_s4, %s680_s5 }
 0x21e   :  { %p556_p3 = pnand %p554_p2, %p551_p1 }
 0x220   :  { %559 = shalt.err (!%p556_p3)
}
 0x221   :  { %283 = dma.vmem_to_hbm [thread:$0]  %s278_s9, 256, %s680_s5, [#allocation4], %s568_s30, %s568_s30, %s569_s6  }
 0x222   :  { %564 = dma.done.wait [#allocation4], 256  }
 0x223   :  { %565 = vsyncadd [#allocation4], 4294967040 }
 0x224   :  { %287 = vsyncpa [#allocation3], 1 }
 0x225   :  { %288 = vsyncpa [#allocation6], 1 }
 0x226   :  { %289 = vsyncpa [#allocation4], 1 }

</bundles_post_ra>
